<compile_context>
chip_gen: v7x
topology: tpu7x:2x2x1
jax: 0.10.0
libtpu: 0.0.40
codegen_flags: <defaults>
</compile_context>

<pallas_src>
import functools

import numpy as np
import jax
import jax.numpy as jnp
from jax.experimental import pallas as pl
from jax.experimental.pallas import tpu as pltpu


def conv_tower_kernel(xunf_ref, w1_ref, w2_ref, wds_ref, b_ref, eca_ref, o_ref,
                      *, K, pad, Cin, L, L_out, pool_k, Bt):
    """Processes Bt batch elements per grid step (statically unrolled).

    xunf_ref : (Bt, K*Cin, L)    tap-unfolded, zero-padded input (bf16)
    w1_ref   : (Cout, K*Cin)     conv1 weights, tap-major, bn1 scale folded (bf16)
    w2_ref   : (Cout, K*Cout)    conv2 weights, tap-major, bn2 scale folded (bf16)
    wds_ref  : (Cout, Cin)       1x1 downsample weights, bn scale folded (bf16)
    b_ref    : (3, Cout, 1)      folded BN biases (f32)
    eca_ref  : (Cout, 3)         ECA channel-conv taps, broadcast over channels (f32)
    o_ref    : (Bt, Cout, L_out) output (f32)
    """
    Cout = o_ref.shape[1]
    L_valid = L_out * pool_k

    # Hoist grid-step-invariant loads out of the batch-block loop.
    w1m = w1_ref[...]
    w2m = w2_ref[...]
    wdsm = wds_ref[...]
    b1 = b_ref[0]
    b2 = b_ref[1]
    bds = b_ref[2]
    e_prev = eca_ref[:, 0:1]          # (Cout, 1)
    e_mid = eca_ref[:, 1:2]
    e_nxt = eca_ref[:, 2:3]

    for bt in range(Bt):
        x1 = xunf_ref[bt]                                   # (K*Cin, L) bf16

        # ---- conv1 + folded bn1 scale: ONE MXU dot, contraction depth K*Cin ----
        acc1 = jnp.dot(w1m, x1, preferred_element_type=jnp.float32)
        y1 = jnp.maximum(acc1 + b1, 0.0)                    # (Cout, L) f32, relu

        # ---- conv2 + folded bn2 scale: tap-unfold relu(conv1) in registers ----
        # Sublane concat of (Cout, L) f32 pieces is natively aligned; a single
        # downcast produces the bf16 MXU operand (no staging scratch, no
        # unaligned masked stores).
        zpad = jnp.zeros((Cout, pad), jnp.float32)
        y1p = jnp.concatenate([zpad, y1, zpad], axis=1)      # (Cout, L + 2*pad)
        y_unf = jnp.concatenate([y1p[:, k:k + L] for k in range(K)],
                                axis=0).astype(jnp.bfloat16)  # (K*Cout, L)
        y2 = jnp.dot(w2m, y_unf, preferred_element_type=jnp.float32) + b2

        # ---- ECA: global mean over L, 3-tap channel conv via sublane shifts ----
        # Zero padding at the channel boundaries is exact by construction
        # (explicit concat with a zero row), no Cout^2 matrix / MXU matvec.
        avg = jnp.mean(y2, axis=1, keepdims=True)            # (Cout, 1) f32
        z1 = jnp.zeros((1, 1), jnp.float32)
        prev = jnp.concatenate([z1, avg[:Cout - 1, :]], axis=0)   # avg[c-1], 0 at c=0
        nxt = jnp.concatenate([avg[1:, :], z1], axis=0)           # avg[c+1], 0 at c=Cout-1
        gate = jax.nn.sigmoid(e_mid * avg + e_prev * prev + e_nxt * nxt)

        # ---- 1x1 downsample residual: raw input == center-tap block of x_unf ----
        xc = x1[pad * Cin:(pad + 1) * Cin, :]                 # (Cin, L) bf16
        res = jnp.dot(wdsm, xc, preferred_element_type=jnp.float32) + bds

        y4 = y2 * gate + res                                  # (Cout, L) f32

        # ---- maxpool(kernel=stride=pool_k) + relu: one lane-dense store ----
        # TODO(synk): replace the reshape compaction with a stride-pool_k lane
        # selection (ref[pl.ds(..., stride=pool_k)] from a VMEM staging ref)
        # once minor-dim strided loads are confirmed on the target toolchain.
        pooled = jnp.max(y4[:, :L_valid].reshape(Cout, L_out, pool_k), axis=-1)
        o_ref[bt] = jnp.maximum(pooled, 0.0)


def _pick_batch_block(B, max_bt=4):
    """Largest divisor of B that is <= max_bt (amortizes per-grid-step cost)."""
    for bt in range(min(B, max_bt), 0, -1):
        if B % bt == 0:
            return bt
    return 1


@functools.partial(jax.jit, static_argnames=("K",))
def conv_tower(x, w1, w2, wds, bn_params, eca_w, *, K):
    """x: (B, Cin, L); w1: (Cout, Cin, K); w2: (Cout, Cout, K); wds: (Cout, Cin);
    bn_params: (3, 2, Cout, 1) eval-mode BN folded to [layer][scale|bias];
    eca_w: (3,) ECA channel-conv taps."""
    B, Cin, L = x.shape
    Cout = w1.shape[0]
    assert K % 2 == 1, "length-preserving conv assumes odd kernel size"
    pad = K // 2
    pool_k = K // 2
    assert pool_k >= 1, "maxpool kernel K//2 must be >= 1"
    L_out = L // pool_k              # MaxPool1d floors: tail columns dropped
    Bt = _pick_batch_block(B)

    scale = bn_params[:, 0]          # (3, Cout, 1)
    bias = bn_params[:, 1]           # (3, Cout, 1), stays f32

    # Fold BN scales into the conv weights host-side; tap-major (Cout, K*C)
    # layout so each conv layer is a single MXU dot with contraction K*C.
    w1_u = jnp.transpose(w1 * scale[0][:, :, None],
                         (0, 2, 1)).reshape(Cout, K * Cin).astype(jnp.bfloat16)
    w2_u = jnp.transpose(w2 * scale[1][:, :, None],
                         (0, 2, 1)).reshape(Cout, K * Cout).astype(jnp.bfloat16)
    wds_s = (wds * scale[2]).astype(jnp.bfloat16)

    # Host-side tap unfold of the zero-padded input: (B, K*Cin, L).
    # Block k holds xpad[:, :, k:k+L]; the center-tap block (k == pad) is the
    # raw input, reused in-kernel for the 1x1 downsample conv.
    xpad = jnp.pad(x, ((0, 0), (0, 0), (pad, pad)))
    x_unf = jnp.concatenate([xpad[:, :, k:k + L] for k in range(K)],
                            axis=1).astype(jnp.bfloat16)

    # ECA taps pre-broadcast over channels -> pure VPU multiplies in-kernel.
    eca_b = jnp.broadcast_to(eca_w.reshape(1, 3).astype(jnp.float32), (Cout, 3))

    kernel = functools.partial(conv_tower_kernel, K=K, pad=pad, Cin=Cin, L=L,
                               L_out=L_out, pool_k=pool_k, Bt=Bt)

    grid_spec = pltpu.PrefetchScalarGridSpec(
        num_scalar_prefetch=0,
        grid=(B // Bt,),
        in_specs=[
            pl.BlockSpec((Bt, K * Cin, L), lambda b: (b, 0, 0)),
            pl.BlockSpec((Cout, K * Cin), lambda b: (0, 0)),
            pl.BlockSpec((Cout, K * Cout), lambda b: (0, 0)),
            pl.BlockSpec((Cout, Cin), lambda b: (0, 0)),
            pl.BlockSpec((3, Cout, 1), lambda b: (0, 0, 0)),
            pl.BlockSpec((Cout, 3), lambda b: (0, 0)),
        ],
        out_specs=pl.BlockSpec((Bt, Cout, L_out), lambda b: (b, 0, 0)),
    )

    return pl.pallas_call(
        kernel,
        out_shape=jax.ShapeDtypeStruct((B, Cout, L_out), jnp.float32),
        grid_spec=grid_spec,
        compiler_params=pltpu.CompilerParams(
            # Batch axis parallel -> shardable across TensorCores.
            dimension_semantics=("parallel",),
            # 48 MiB: above the 16/32 MiB defaults (v5e/v6e), below v7x's
            # 64 MiB physical VMEM so DMA headroom remains.
            vmem_limit_bytes=48 * 1024 * 1024),
    )(x_unf, w1_u, w2_u, wds_s, bias, eca_b)


def conv_tower_ref(x, w1, w2, wds, bn_params, eca_w, K):
    """Pure-JAX reference matching the PyTorch forward (eval-mode BN, f32)."""
    pad = K // 2
    pool_k = K // 2
    B, _, L = x.shape
    Cout = w1.shape[0]
    dn = ('NCH', 'OIH', 'NCH')

    def conv1d(inp, w, p):
        return jax.lax.conv_general_dilated(inp, w, (1,), [(p, p)],
                                            dimension_numbers=dn)

    def bn(inp, i):
        return inp * bn_params[i, 0][None] + bn_params[i, 1][None]

    y = jax.nn.relu(bn(conv1d(x, w1, pad), 0))
    y = bn(conv1d(y, w2, pad), 1)
    avg = jnp.mean(y, axis=2, keepdims=True)
    ecam = (eca_w[0] * jnp.eye(Cout, k=-1) + eca_w[1] * jnp.eye(Cout)
            + eca_w[2] * jnp.eye(Cout, k=1))
    gate = jax.nn.sigmoid(jnp.einsum('dc,bcx->bdx', ecam, avg))
    y = y * gate
    res = bn(jnp.einsum('oc,bcl->bol', wds, x), 2)
    y = y + res
    L_out = L // pool_k
    y = y[:, :, :L_out * pool_k].reshape(B, Cout, L_out, pool_k).max(axis=-1)
    return jax.nn.relu(y)


if __name__ == "__main__":
    B, Cin, Cout, L, K = 2, 4, 8, 16, 5   # ECA channel-conv kernel size = 3 (ECA-Net default)

    key = jax.random.PRNGKey(0)
    ks = jax.random.split(key, 6)
    x = jax.random.normal(ks[0], (B, Cin, L), jnp.float32)
    w1 = jax.random.normal(ks[1], (Cout, Cin, K), jnp.float32) / np.sqrt(Cin * K)
    w2 = jax.random.normal(ks[2], (Cout, Cout, K), jnp.float32) / np.sqrt(Cout * K)
    wds = jax.random.normal(ks[3], (Cout, Cin), jnp.float32) / np.sqrt(Cin)
    eca_w = jax.random.normal(ks[4], (3,), jnp.float32) / np.sqrt(3.0)

    # Deterministic eval-mode BatchNorm params, folded into scale/bias.
    eps = 1e-5
    bn_keys = jax.random.split(ks[5], 12).reshape(3, 4, 2)
    folded = []
    for i in range(3):
        kg, kb, km, kv = bn_keys[i]
        gamma = 1.0 + 0.1 * jax.random.normal(kg, (Cout,), jnp.float32)
        beta = 0.1 * jax.random.normal(kb, (Cout,), jnp.float32)
        mean = 0.1 * jax.random.normal(km, (Cout,), jnp.float32)
        var = jax.nn.softplus(jax.random.normal(kv, (Cout,), jnp.float32)) + 0.5
        scale = gamma / jnp.sqrt(var + eps)
        bias = beta - mean * scale
        folded.append(jnp.stack([scale, bias]))
    bn_params = jnp.stack(folded)[..., None]          # (3, 2, Cout, 1)

    out = jax.block_until_ready(
        conv_tower(x, w1, w2, wds, bn_params, eca_w, K=K))

    ref = conv_tower_ref(x, w1, w2, wds, bn_params, eca_w, K)
    assert out.shape == ref.shape == (B, Cout, L // (K // 2))
    np.testing.assert_allclose(np.asarray(out), np.asarray(ref),
                               atol=5e-2, rtol=5e-2)
    print("KERNEL_OK")
</pallas_src>

<mosaic_0001>
module attributes {stable_mosaic.version = 11 : i64} {
  func.func @conv_tower_kernel(%arg0: i32, %arg1: memref<2x20x16xbf16, #tpu.memory_space<vmem>>, %arg2: memref<8x20xbf16, #tpu.memory_space<vmem>>, %arg3: memref<8x40xbf16, #tpu.memory_space<vmem>>, %arg4: memref<8x4xbf16, #tpu.memory_space<vmem>>, %arg5: memref<3x8x1xf32, #tpu.memory_space<vmem>>, %arg6: memref<8x3xf32, #tpu.memory_space<vmem>>, %arg7: memref<2x8x8xf32, #tpu.memory_space<vmem>>) attributes {dimension_semantics = [#tpu.dimension_semantics<parallel>], iteration_bounds = array<i64: 1>, scalar_prefetch = 0 : i64, scratch_operands = 0 : i64, tpu.core_type = #tpu.core_type<tc>, window_params = [{transform_indices = @transform_0, window_bounds = array<i64: 2, 20, 16>}, {pipeline_mode = #tpu.pipeline_mode<synchronous>, transform_indices = @transform_1, window_bounds = array<i64: 8, 20>}, {pipeline_mode = #tpu.pipeline_mode<synchronous>, transform_indices = @transform_2, window_bounds = array<i64: 8, 40>}, {pipeline_mode = #tpu.pipeline_mode<synchronous>, transform_indices = @transform_3, window_bounds = array<i64: 8, 4>}, {pipeline_mode = #tpu.pipeline_mode<synchronous>, transform_indices = @transform_4, window_bounds = array<i64: 3, 8, 1>}, {pipeline_mode = #tpu.pipeline_mode<synchronous>, transform_indices = @transform_5, window_bounds = array<i64: 8, 3>}, {transform_indices = @transform_6, window_bounds = array<i64: 2, 8, 8>}]} {
    %c0 = arith.constant 0 : index
    %c0_0 = arith.constant 0 : index
    %0 = vector.load %arg2[%c0, %c0_0] : memref<8x20xbf16, #tpu.memory_space<vmem>>, vector<8x20xbf16>
    %c0_1 = arith.constant 0 : index
    %c0_2 = arith.constant 0 : index
    %1 = vector.load %arg3[%c0_1, %c0_2] : memref<8x40xbf16, #tpu.memory_space<vmem>>, vector<8x40xbf16>
    %c0_3 = arith.constant 0 : index
    %c0_4 = arith.constant 0 : index
    %2 = vector.load %arg4[%c0_3, %c0_4] : memref<8x4xbf16, #tpu.memory_space<vmem>>, vector<8x4xbf16>
    %c0_5 = arith.constant 0 : index
    %c0_6 = arith.constant 0 : index
    %c0_7 = arith.constant 0 : index
    %3 = vector.load %arg5[%c0_5, %c0_6, %c0_7] : memref<3x8x1xf32, #tpu.memory_space<vmem>>, vector<1x8x1xf32>
    %4 = vector.shape_cast %3 : vector<1x8x1xf32> to vector<8x1xf32>
    %c1 = arith.constant 1 : index
    %c0_8 = arith.constant 0 : index
    %c0_9 = arith.constant 0 : index
    %5 = vector.load %arg5[%c1, %c0_8, %c0_9] : memref<3x8x1xf32, #tpu.memory_space<vmem>>, vector<1x8x1xf32>
    %6 = vector.shape_cast %5 : vector<1x8x1xf32> to vector<8x1xf32>
    %c2 = arith.constant 2 : index
    %c0_10 = arith.constant 0 : index
    %c0_11 = arith.constant 0 : index
    %7 = vector.load %arg5[%c2, %c0_10, %c0_11] : memref<3x8x1xf32, #tpu.memory_space<vmem>>, vector<1x8x1xf32>
    %8 = vector.shape_cast %7 : vector<1x8x1xf32> to vector<8x1xf32>
    %c0_12 = arith.constant 0 : index
    %c0_13 = arith.constant 0 : index
    %9 = vector.load %arg6[%c0_12, %c0_13] : memref<8x3xf32, #tpu.memory_space<vmem>>, vector<8x1xf32>
    %c0_14 = arith.constant 0 : index
    %c1_15 = arith.constant 1 : index
    %10 = vector.load %arg6[%c0_14, %c1_15] : memref<8x3xf32, #tpu.memory_space<vmem>>, vector<8x1xf32>
    %c0_16 = arith.constant 0 : index
    %c2_17 = arith.constant 2 : index
    %11 = vector.load %arg6[%c0_16, %c2_17] : memref<8x3xf32, #tpu.memory_space<vmem>>, vector<8x1xf32>
    %c0_18 = arith.constant 0 : index
    %c0_19 = arith.constant 0 : index
    %c0_20 = arith.constant 0 : index
    %12 = vector.load %arg1[%c0_18, %c0_19, %c0_20] : memref<2x20x16xbf16, #tpu.memory_space<vmem>>, vector<1x20x16xbf16>
    %13 = vector.shape_cast %12 : vector<1x20x16xbf16> to vector<20x16xbf16>
    %cst = arith.constant dense<0.000000e+00> : vector<8x16xf32>
    %14 = tpu.matmul %0, %13, %cst {dimension_numbers = #tpu.dot_dimension_numbers<[1], [0], [0], [1], [0, 0, 1, 1], [], []>} : vector<8x20xbf16>, vector<20x16xbf16>, vector<8x16xf32> -> vector<8x16xf32>
    %15 = vector.broadcast %4 : vector<8x1xf32> to vector<8x16xf32>
    %16 = arith.addf %14, %15 : vector<8x16xf32>
    %cst_21 = arith.constant 0.000000e+00 : f32
    %17 = vector.broadcast %cst_21 : f32 to vector<8x16xf32>
    %18 = arith.maximumf %16, %17 : vector<8x16xf32>
    %cst_22 = arith.constant 0.000000e+00 : f32
    %19 = vector.broadcast %cst_22 : f32 to vector<8x2xf32>
    %20 = tpu.concatenate %19, %18, %19 in 1 : vector<8x2xf32>, vector<8x16xf32>, vector<8x2xf32> -> vector<8x20xf32>
    %21 = vector.extract_strided_slice %20 {offsets = [0, 0], sizes = [8, 16], strides = [1, 1]} : vector<8x20xf32> to vector<8x16xf32>
    %22 = vector.extract_strided_slice %20 {offsets = [0, 1], sizes = [8, 16], strides = [1, 1]} : vector<8x20xf32> to vector<8x16xf32>
    %23 = vector.extract_strided_slice %20 {offsets = [0, 2], sizes = [8, 16], strides = [1, 1]} : vector<8x20xf32> to vector<8x16xf32>
    %24 = vector.extract_strided_slice %20 {offsets = [0, 3], sizes = [8, 16], strides = [1, 1]} : vector<8x20xf32> to vector<8x16xf32>
    %25 = vector.extract_strided_slice %20 {offsets = [0, 4], sizes = [8, 16], strides = [1, 1]} : vector<8x20xf32> to vector<8x16xf32>
    %26 = tpu.concatenate %21, %22, %23, %24, %25 in 0 : vector<8x16xf32>, vector<8x16xf32>, vector<8x16xf32>, vector<8x16xf32>, vector<8x16xf32> -> vector<40x16xf32>
    %27 = arith.truncf %26 : vector<40x16xf32> to vector<40x16xbf16>
    %cst_23 = arith.constant dense<0.000000e+00> : vector<8x16xf32>
    %28 = tpu.matmul %1, %27, %cst_23 {dimension_numbers = #tpu.dot_dimension_numbers<[1], [0], [0], [1], [0, 0, 1, 1], [], []>} : vector<8x40xbf16>, vector<40x16xbf16>, vector<8x16xf32> -> vector<8x16xf32>
    %29 = vector.broadcast %6 : vector<8x1xf32> to vector<8x16xf32>
    %30 = arith.addf %28, %29 : vector<8x16xf32>
    %cst_24 = arith.constant dense<0.000000e+00> : vector<8xf32>
    %31 = vector.multi_reduction <add>, %30, %cst_24 [1] : vector<8x16xf32> to vector<8xf32>
    %32 = vector.shape_cast %31 : vector<8xf32> to vector<8x1xf32>
    %cst_25 = arith.constant 1.600000e+01 : f32
    %33 = vector.broadcast %cst_25 : f32 to vector<8x1xf32>
    %34 = arith.divf %32, %33 : vector<8x1xf32>
    %cst_26 = arith.constant 0.000000e+00 : f32
    %35 = vector.broadcast %cst_26 : f32 to vector<1x1xf32>
    %36 = vector.extract_strided_slice %34 {offsets = [0, 0], sizes = [7, 1], strides = [1, 1]} : vector<8x1xf32> to vector<7x1xf32>
    %37 = tpu.concatenate %35, %36 in 0 : vector<1x1xf32>, vector<7x1xf32> -> vector<8x1xf32>
    %38 = vector.extract_strided_slice %34 {offsets = [1, 0], sizes = [7, 1], strides = [1, 1]} : vector<8x1xf32> to vector<7x1xf32>
    %39 = tpu.concatenate %38, %35 in 0 : vector<7x1xf32>, vector<1x1xf32> -> vector<8x1xf32>
    %40 = arith.mulf %10, %34 : vector<8x1xf32>
    %41 = arith.mulf %9, %37 : vector<8x1xf32>
    %42 = arith.addf %40, %41 : vector<8x1xf32>
    %43 = arith.mulf %11, %39 : vector<8x1xf32>
    %44 = arith.addf %42, %43 : vector<8x1xf32>
    %45 = arith.negf %44 : vector<8x1xf32>
    %46 = math.exp %45 : vector<8x1xf32>
    %cst_27 = arith.constant 1.000000e+00 : f32
    %47 = vector.broadcast %cst_27 : f32 to vector<8x1xf32>
    %48 = arith.addf %47, %46 : vector<8x1xf32>
    %49 = arith.divf %47, %48 : vector<8x1xf32>
    %50 = vector.extract_strided_slice %13 {offsets = [8, 0], sizes = [4, 16], strides = [1, 1]} : vector<20x16xbf16> to vector<4x16xbf16>
    %cst_28 = arith.constant dense<0.000000e+00> : vector<8x16xf32>
    %51 = tpu.matmul %2, %50, %cst_28 {dimension_numbers = #tpu.dot_dimension_numbers<[1], [0], [0], [1], [0, 0, 1, 1], [], []>} : vector<8x4xbf16>, vector<4x16xbf16>, vector<8x16xf32> -> vector<8x16xf32>
    %52 = vector.broadcast %8 : vector<8x1xf32> to vector<8x16xf32>
    %53 = arith.addf %51, %52 : vector<8x16xf32>
    %54 = vector.broadcast %49 : vector<8x1xf32> to vector<8x16xf32>
    %55 = arith.mulf %30, %54 : vector<8x16xf32>
    %56 = arith.addf %55, %53 : vector<8x16xf32>
    %57 = vector.shape_cast %56 : vector<8x16xf32> to vector<8x8x2xf32>
    %cst_29 = arith.constant dense<0xFF800000> : vector<8x8xf32>
    %58 = vector.multi_reduction <maximumf>, %57, %cst_29 [2] : vector<8x8x2xf32> to vector<8x8xf32>
    %cst_30 = arith.constant 0.000000e+00 : f32
    %59 = vector.broadcast %cst_30 : f32 to vector<8x8xf32>
    %60 = arith.maximumf %58, %59 : vector<8x8xf32>
    %c0_31 = arith.constant 0 : index
    %c0_32 = arith.constant 0 : index
    %c0_33 = arith.constant 0 : index
    %61 = vector.load %arg7[%c0_31, %c0_32, %c0_33] : memref<2x8x8xf32, #tpu.memory_space<vmem>>, vector<1x8x8xf32>
    %62 = vector.shape_cast %61 : vector<1x8x8xf32> to vector<8x8xf32>
    %63 = vector.shape_cast %60 : vector<8x8xf32> to vector<1x8x8xf32>
    tpu.vector_store %arg7[%c0_31, %c0_32, %c0_33], %63 {strides = array<i32>} : memref<2x8x8xf32, #tpu.memory_space<vmem>>, vector<1x8x8xf32>,
    %c1_34 = arith.constant 1 : index
    %c0_35 = arith.constant 0 : index
    %c0_36 = arith.constant 0 : index
    %64 = vector.load %arg1[%c1_34, %c0_35, %c0_36] : memref<2x20x16xbf16, #tpu.memory_space<vmem>>, vector<1x20x16xbf16>
    %65 = vector.shape_cast %64 : vector<1x20x16xbf16> to vector<20x16xbf16>
    %cst_37 = arith.constant dense<0.000000e+00> : vector<8x16xf32>
    %66 = tpu.matmul %0, %65, %cst_37 {dimension_numbers = #tpu.dot_dimension_numbers<[1], [0], [0], [1], [0, 0, 1, 1], [], []>} : vector<8x20xbf16>, vector<20x16xbf16>, vector<8x16xf32> -> vector<8x16xf32>
    %67 = vector.broadcast %4 : vector<8x1xf32> to vector<8x16xf32>
    %68 = arith.addf %66, %67 : vector<8x16xf32>
    %cst_38 = arith.constant 0.000000e+00 : f32
    %69 = vector.broadcast %cst_38 : f32 to vector<8x16xf32>
    %70 = arith.maximumf %68, %69 : vector<8x16xf32>
    %cst_39 = arith.constant 0.000000e+00 : f32
    %71 = vector.broadcast %cst_39 : f32 to vector<8x2xf32>
    %72 = tpu.concatenate %71, %70, %71 in 1 : vector<8x2xf32>, vector<8x16xf32>, vector<8x2xf32> -> vector<8x20xf32>
    %73 = vector.extract_strided_slice %72 {offsets = [0, 0], sizes = [8, 16], strides = [1, 1]} : vector<8x20xf32> to vector<8x16xf32>
    %74 = vector.extract_strided_slice %72 {offsets = [0, 1], sizes = [8, 16], strides = [1, 1]} : vector<8x20xf32> to vector<8x16xf32>
    %75 = vector.extract_strided_slice %72 {offsets = [0, 2], sizes = [8, 16], strides = [1, 1]} : vector<8x20xf32> to vector<8x16xf32>
    %76 = vector.extract_strided_slice %72 {offsets = [0, 3], sizes = [8, 16], strides = [1, 1]} : vector<8x20xf32> to vector<8x16xf32>
    %77 = vector.extract_strided_slice %72 {offsets = [0, 4], sizes = [8, 16], strides = [1, 1]} : vector<8x20xf32> to vector<8x16xf32>
    %78 = tpu.concatenate %73, %74, %75, %76, %77 in 0 : vector<8x16xf32>, vector<8x16xf32>, vector<8x16xf32>, vector<8x16xf32>, vector<8x16xf32> -> vector<40x16xf32>
    %79 = arith.truncf %78 : vector<40x16xf32> to vector<40x16xbf16>
    %cst_40 = arith.constant dense<0.000000e+00> : vector<8x16xf32>
    %80 = tpu.matmul %1, %79, %cst_40 {dimension_numbers = #tpu.dot_dimension_numbers<[1], [0], [0], [1], [0, 0, 1, 1], [], []>} : vector<8x40xbf16>, vector<40x16xbf16>, vector<8x16xf32> -> vector<8x16xf32>
    %81 = vector.broadcast %6 : vector<8x1xf32> to vector<8x16xf32>
    %82 = arith.addf %80, %81 : vector<8x16xf32>
    %cst_41 = arith.constant dense<0.000000e+00> : vector<8xf32>
    %83 = vector.multi_reduction <add>, %82, %cst_41 [1] : vector<8x16xf32> to vector<8xf32>
    %84 = vector.shape_cast %83 : vector<8xf32> to vector<8x1xf32>
    %cst_42 = arith.constant 1.600000e+01 : f32
    %85 = vector.broadcast %cst_42 : f32 to vector<8x1xf32>
    %86 = arith.divf %84, %85 : vector<8x1xf32>
    %cst_43 = arith.constant 0.000000e+00 : f32
    %87 = vector.broadcast %cst_43 : f32 to vector<1x1xf32>
    %88 = vector.extract_strided_slice %86 {offsets = [0, 0], sizes = [7, 1], strides = [1, 1]} : vector<8x1xf32> to vector<7x1xf32>
    %89 = tpu.concatenate %87, %88 in 0 : vector<1x1xf32>, vector<7x1xf32> -> vector<8x1xf32>
    %90 = vector.extract_strided_slice %86 {offsets = [1, 0], sizes = [7, 1], strides = [1, 1]} : vector<8x1xf32> to vector<7x1xf32>
    %91 = tpu.concatenate %90, %87 in 0 : vector<7x1xf32>, vector<1x1xf32> -> vector<8x1xf32>
    %92 = arith.mulf %10, %86 : vector<8x1xf32>
    %93 = arith.mulf %9, %89 : vector<8x1xf32>
    %94 = arith.addf %92, %93 : vector<8x1xf32>
    %95 = arith.mulf %11, %91 : vector<8x1xf32>
    %96 = arith.addf %94, %95 : vector<8x1xf32>
    %97 = arith.negf %96 : vector<8x1xf32>
    %98 = math.exp %97 : vector<8x1xf32>
    %cst_44 = arith.constant 1.000000e+00 : f32
    %99 = vector.broadcast %cst_44 : f32 to vector<8x1xf32>
    %100 = arith.addf %99, %98 : vector<8x1xf32>
    %101 = arith.divf %99, %100 : vector<8x1xf32>
    %102 = vector.extract_strided_slice %65 {offsets = [8, 0], sizes = [4, 16], strides = [1, 1]} : vector<20x16xbf16> to vector<4x16xbf16>
    %cst_45 = arith.constant dense<0.000000e+00> : vector<8x16xf32>
    %103 = tpu.matmul %2, %102, %cst_45 {dimension_numbers = #tpu.dot_dimension_numbers<[1], [0], [0], [1], [0, 0, 1, 1], [], []>} : vector<8x4xbf16>, vector<4x16xbf16>, vector<8x16xf32> -> vector<8x16xf32>
    %104 = vector.broadcast %8 : vector<8x1xf32> to vector<8x16xf32>
    %105 = arith.addf %103, %104 : vector<8x16xf32>
    %106 = vector.broadcast %101 : vector<8x1xf32> to vector<8x16xf32>
    %107 = arith.mulf %82, %106 : vector<8x16xf32>
    %108 = arith.addf %107, %105 : vector<8x16xf32>
    %109 = vector.shape_cast %108 : vector<8x16xf32> to vector<8x8x2xf32>
    %cst_46 = arith.constant dense<0xFF800000> : vector<8x8xf32>
    %110 = vector.multi_reduction <maximumf>, %109, %cst_46 [2] : vector<8x8x2xf32> to vector<8x8xf32>
    %cst_47 = arith.constant 0.000000e+00 : f32
    %111 = vector.broadcast %cst_47 : f32 to vector<8x8xf32>
    %112 = arith.maximumf %110, %111 : vector<8x8xf32>
    %c1_48 = arith.constant 1 : index
    %c0_49 = arith.constant 0 : index
    %c0_50 = arith.constant 0 : index
    %113 = vector.load %arg7[%c1_48, %c0_49, %c0_50] : memref<2x8x8xf32, #tpu.memory_space<vmem>>, vector<1x8x8xf32>
    %114 = vector.shape_cast %113 : vector<1x8x8xf32> to vector<8x8xf32>
    %115 = vector.shape_cast %112 : vector<8x8xf32> to vector<1x8x8xf32>
    tpu.vector_store %arg7[%c1_48, %c0_49, %c0_50], %115 {strides = array<i32>} : memref<2x8x8xf32, #tpu.memory_space<vmem>>, vector<1x8x8xf32>,
    return
  }
  func.func @transform_0(%arg0: i32) -> (i32, i32, i32) {
    %c0_i32 = arith.constant 0 : i32
    %c0_i32_0 = arith.constant 0 : i32
    %c0_i32_1 = arith.constant 0 : i32
    return %arg0, %c0_i32, %c0_i32_0 : i32, i32, i32
  }
  func.func @transform_1(%arg0: i32) -> (i32, i32) {
    %c0_i32 = arith.constant 0 : i32
    %c0_i32_0 = arith.constant 0 : i32
    %c0_i32_1 = arith.constant 0 : i32
    return %c0_i32, %c0_i32_0 : i32, i32
  }
  func.func @transform_2(%arg0: i32) -> (i32, i32) {
    %c0_i32 = arith.constant 0 : i32
    %c0_i32_0 = arith.constant 0 : i32
    %c0_i32_1 = arith.constant 0 : i32
    return %c0_i32, %c0_i32_0 : i32, i32
  }
  func.func @transform_3(%arg0: i32) -> (i32, i32) {
    %c0_i32 = arith.constant 0 : i32
    %c0_i32_0 = arith.constant 0 : i32
    %c0_i32_1 = arith.constant 0 : i32
    return %c0_i32, %c0_i32_0 : i32, i32
  }
  func.func @transform_4(%arg0: i32) -> (i32, i32, i32) {
    %c0_i32 = arith.constant 0 : i32
    %c0_i32_0 = arith.constant 0 : i32
    %c0_i32_1 = arith.constant 0 : i32
    %c0_i32_2 = arith.constant 0 : i32
    return %c0_i32, %c0_i32_0, %c0_i32_1 : i32, i32, i32
  }
  func.func @transform_5(%arg0: i32) -> (i32, i32) {
    %c0_i32 = arith.constant 0 : i32
    %c0_i32_0 = arith.constant 0 : i32
    %c0_i32_1 = arith.constant 0 : i32
    return %c0_i32, %c0_i32_0 : i32, i32
  }
  func.func @transform_6(%arg0: i32) -> (i32, i32, i32) {
    %c0_i32 = arith.constant 0 : i32
    %c0_i32_0 = arith.constant 0 : i32
    %c0_i32_1 = arith.constant 0 : i32
    return %arg0, %c0_i32, %c0_i32_0 : i32, i32, i32
  }
}

</mosaic_0001>

<bundles_post_ra>
// kernel: conv_tower.1
= control target key start
LH: loop header
LB: loop body
LE: loop exit
PB: predicated region body
PF: predicated region fallthrough
CT: control target
= control target key end

     0   :  { %vm55_vm0 = vcmask 1041408   ;;  %v1135_v2 = vmov 0.0   ;;  %vm1136_vm1 = vmmov 0   ;;  %v1137_v6 = vmov 0   ;;  %s1449_s0 = inlined_call_operand.vmem [shape: bf16[2,20,16], index: 0, kind: input, shape index: {}]   ;;  %s1450_s1 = inlined_call_operand.vmem [shape: bf16[8,20], index: 1, kind: input, shape index: {}]   ;;  %s1451_s2 = inlined_call_operand.vmem [shape: bf16[8,40], index: 2, kind: input, shape index: {}]   ;;  %s1452_s3 = inlined_call_operand.vmem [shape: bf16[8,4], index: 3, kind: input, shape index: {}]   ;;  %s1453_s4 = inlined_call_operand.vmem [shape: f32[3,8,1], index: 4, kind: input, shape index: {}]   ;;  %s1454_s5 = inlined_call_operand.vmem [shape: f32[8,3], index: 5, kind: input, shape index: {}]   ;;  %s1455_s6 = inlined_call_operand.hbm [shape: f32[2,8,8], index: 6, kind: output, shape index: {}]  }
   0x1   :  { %v34_v0 = vld [vmem:[%s1449_s0] sm:$0xf]  ;;  %v1197_v1 = vld [vmem:[%s1449_s0 + $0x4] sm:$0xf]  ;;  %1026 = vmatprep.subr.bf16.mxu0 %v1135_v2  ;;  %1034 = vmatprep.subr.bf16.mxu1 %v1135_v2 }
   0x2   :  { %v987_v3 = vcombine.low %v34_v0, %v1197_v1  ;;  %v1100_v4 = vld [vmem:[%s1449_s0 + $0x8] ss:$0 sps:$4 sm:$0x33]   ;;  %1030 = vmatprep.mubr.msk.bf16.mxu0 %vm1136_vm1, %v1135_v2  ;;  %v28_v5 = vld [vmem:[%s1453_s4] sm:$0xff]  ;;  %1040 = vmatprep.mubr.msk.bf16.mxu1 %vm1136_vm1, %v1135_v2 }
   0x3   :  { %1095 = vset.pattern.permute.xlu0 %v1137_v6 }
   0x4   :  { %1027 = vmatpush3.bf16.msra.mxu0 %v987_v3 }
   0x5   :  { %11 = vsyncpa [#allocation3], 0  ;;  %1028 = vmatprep.subr.bf16.mxu0 %v1135_v2  ;;  %v57_v7 = vsel %vm55_vm0, %v1100_v4, 0  ;;  %39 = vperm.xlu0 %1095, %v28_v5   ;;  %v25_v8 = vld [vmem:[%s1450_s1] sm:$0xf]  ;;  %vm51_vm2 = vcmask 162816  }
   0x6   :  { %1096 = vset.pattern.permute.xlu1 %v1137_v6  ;;  %s1138_s7 = smov 2   ;;  %vm104_vm3 = vcmask 15360   ;;  %vm106_vm4 = vcmask 146432   ;;  %s1139_s1 = smov 125   ;;  %vm1143_vm5 = vmmov 1   ;;  %vm133_vm7 = vcmask 1043456  }
   0x7   :  { %s1140_s8 = smov 127   ;;  %s1141_s9 = smov 126   ;;  %vm1229_vm6 = vmpackc.low %vm1143_vm5, %vm106_vm4  ;;  %v996_v27 = vld [vmem:[%s1449_s0 + $0xc] sm:$0xf]  ;;  %v1243_v28 = vld [vmem:[%s1449_s0 + $0x10] sm:$0xf] }
   0x8   :  { %1029 = vmatpush3.bf16.msra.mxu0 %v57_v7  ;;  %s1142_s10 = smov 124   ;;  %v26_v30 = vld [vmem:[%s1451_s2] sm:$0xf]  ;;  %vm129_vm8 = vcmask 326656   ;;  %v999_v31 = vcombine.low %v996_v27, %v1243_v28  ;;  %v225_v42 = vsel %vm55_vm0, %v1197_v1, 0  ;;  %vm220_vm9 = vcmask 31744  }
   0x9   :  { %1044 = vmatprep.subr.bf16.mxu0 %v1135_v2  ;;  %v1102_v32 = vld [vmem:[%s1449_s0 + $0x14] ss:$0 sps:$4 sm:$0x33]   ;;  %v27_v45 = vld [vmem:[%s1452_s3] sm:$0xf]  ;;  %v985_v49 = vld [vmem:[%s1453_s4 + $0x8] sm:$0xff] }
   0xa   :  { %v537_v33 = vsel %vm55_vm0, %v1102_v32, 0  ;;  %vm177_vm10 = vcmask 130048   ;;  %v680_v61 = vsel %vm55_vm0, %v1243_v28, 0  ;;  %vm190_vm11 = vcmask 1046528   ;;  %s1144_s22 = smov 1   ;;  %s1148_s25 = smov 116  }
   0xb   :  { %1031 = vmatmul.mubr.msk.bf16.vlgmr.msra.gmra.mrb[0].mxu0 %vm51_vm2, %v25_v8  ;;  %vm186_vm12 = vcmask 1040384   ;;  %s1149_s26 = smov 118   ;;  %s1150_s27 = smov 114   ;;  %vm506_vm13 = vcmask 1041409   ;;  %vm508_vm14 = vcmask 1042434   ;;  %vm510_vm15 = vcmask 1043459  }
   0xc   :  { %1046 = vmatprep.mubr.msk.bf16.mxu0 %vm1136_vm1, %v1135_v2  ;;  %1045 = vmatpush3.bf16.msra.mxu0 %v225_v42  ;;  %vm512_vm0 = vcmask 1044484   ;;  %s1153_s28 = smov [#allocation2]  }
   0xd   :  { %1058 = vmatprep.subr.bf16.mxu0 %v1135_v2  ;;  %s974_s29 = sshll.u32 %s1153_s28, 4  ;;  %s975_s29 = int_to_ptr.vmem [resolvable:$true] %s974_s29 }
   0xe   :  { %s1111_s30 = scalar_lea.vmem %s975_s29, 256  ;;  %p1116_p1 = scmp.lt.s32.totalorder %s975_s29, %s975_s29 }
   0xf   :  { %p1112_p0 = scmp.ne.s32.totalorder %s975_s29, %s1111_s30  ;;  %p1117_p2 = scmp.lt.s32.totalorder %s1111_s30, %s1111_s30 }
  0x11   :  { %p1118_p3 = por %p1117_p2, %p1116_p1 }
  0x13   :  { %1047 = vmatmul.mubr.msk.bf16.vlgmr.msra.gmra.mrb[4].mxu0 %vm220_vm9, %v27_v45  ;;  %p1119_p4 = pnand %p1118_p3, %p1112_p0 }
  0x14   :  { %1064 = vmatprep.mubr.msk.bf16.mxu0 %vm1136_vm1, %v1135_v2 }
  0x84   :  { %v40_v9 = vpop.permute.xlu0 %39 }
  0xde   :  { %v93_v10 = vpop.f32.mrb[0].mxu0 }
  0xdf   :  { %v94_v11 = vadd.f32 %v93_v10, %v40_v9  ;;  %v1032_v12 = vpop.f32.mrb[1].mxu0 }
  0xe0   :  { %v96_v13 = vpop.f32.mrb[2].mxu0 }
  0xe1   :  { %v99_v14 = vmax.f32 %v94_v11, 0.0  ;;  %v1033_v15 = vpop.f32.mrb[3].mxu0 }
  0xe3   :  { %101 = vrot.lane.b32.xlu0 %v99_v14, %s1138_s7 }
  0xe6   :  { %v1295_v62 = vpop.f32.mrb[4].mxu0 }
  0xe7   :  { %v1048_v63 = vpop.f32.mrb[5].mxu0 }
  0xe8   :  { %v264_v0 = vpop.f32.mrb[6].mxu0 }
  0xe9   :  { %v1049_v1 = vpop.f32.mrb[7].mxu0 }
  0xea   :  { %v1151_v1 = vmov 1983009808  }
 0x155   :  { %v102_v16 = vpop.permute.xlu0 %101 }
 0x156   :  { %v105_v17 = vsel %vm104_vm3, 0.0, %v102_v16 }
 0x157   :  { %v107_v18 = vsel %vm106_vm4, %v105_v17, 0.0 }
 0x158   :  { %115 = vrot.lane.b32.xlu0 %v107_v18, %s1139_s1  ;;  %109 = vrot.lane.b32.xlu1 %v107_v18, %s1140_s8 }
 0x15c   :  { %112 = vrot.lane.b32.xlu1 %v107_v18, %s1141_s9 }
 0x160   :  { %118 = vrot.lane.b32.xlu1 %v107_v18, %s1142_s10  ;;  %v986_v18 = vld [vmem:[%s1453_s4 + $0x10] sm:$0xff]  ;;  %s1146_s4 = smov 120  }
 0x1ca   :  { %v110_v19 = vpop.permute.xlu1 %109  ;;  %v116_v22 = vpop.permute.xlu0 %115 }
 0x1cb   :  { %v991_v21 = vpack.c.bf16 %v110_v19, %v105_v17 }
 0x1cd   :  { %1035 = vmatpush3.bf16.msk.msra.mxu1 %vm1229_vm6, %v991_v21 }
 0x1ce   :  { %v113_v23 = vpop.permute.xlu1 %112  ;;  %1036 = vmatprep.subr.bf16.mxu1 %v1135_v2 }
 0x1cf   :  { %v122_v24 = vpack.c.bf16 %v116_v22, %v113_v23  ;;  %v1145_v23 = vmov 1  }
 0x1d1   :  { %1037 = vmatpush3.bf16.msra.mxu1 %v122_v24 }
 0x1d2   :  { %v119_v25 = vpop.permute.xlu1 %118  ;;  %1038 = vmatprep.subr.bf16.mxu1 %v1135_v2 }
 0x1d3   :  { %v123_v26 = vpack.c.bf16 %v119_v25, %v119_v25 }
 0x1d5   :  { %v135_v29 = vsel %vm133_vm7, %v123_v26, 0 }
 0x1d6   :  { %1039 = vmatpush3.bf16.msra.mxu1 %v135_v29 }
 0x1d7   :  { %1050 = vmatprep.subr.bf16.mxu1 %v1135_v2 }
 0x1d9   :  { %1041 = vmatmul.mubr.msk.bf16.vlgmr.msra.gmra.mrb[0].mxu1 %vm129_vm8, %v26_v30 }
 0x1da   :  { %1051 = vmatpush3.bf16.msra.mxu1 %v999_v31  ;;  %1054 = vmatprep.mubr.msk.bf16.mxu1 %vm1136_vm1, %v1135_v2 }
 0x1db   :  { %1052 = vmatprep.subr.bf16.mxu1 %v1135_v2 }
 0x1de   :  { %1053 = vmatpush3.bf16.msra.mxu1 %v537_v33 }
 0x1df   :  { %1068 = vmatprep.subr.bf16.mxu1 %v1135_v2 }
 0x1e1   :  { %1055 = vmatmul.mubr.msk.bf16.vlgmr.msra.gmra.mrb[4].mxu1 %vm51_vm2, %v25_v8  ;;  %v33_v8 = vld [vmem:[%s1454_s5] sm:$0xff]  ;;  %s1147_s5 = smov 122   ;;  %vm516_vm2 = vcmask 1046534  }
 0x1e2   :  { %1070 = vmatprep.mubr.msk.bf16.mxu1 %vm1136_vm1, %v1135_v2  ;;  %1069 = vmatpush3.bf16.msra.mxu1 %v680_v61  ;;  %vm514_vm1 = vcmask 1045509  }
 0x1e9   :  { %1071 = vmatmul.mubr.msk.bf16.vlgmr.msra.gmra.mrb[8].mxu1 %vm220_vm9, %v27_v45 }
 0x2ac   :  { %v171_v34 = vpop.f32.mrb[0].mxu1 }
 0x2ad   :  { %v1042_v35 = vpop.f32.mrb[1].mxu1 }
 0x2ae   :  { %v174_v36 = vpop.f32.mrb[2].mxu1 }
 0x2af   :  { %v1043_v37 = vpop.f32.mrb[3].mxu1 }
 0x2b4   :  { %v573_v38 = vpop.f32.mrb[4].mxu1 }
 0x2b5   :  { %v574_v39 = vadd.f32 %v573_v38, %v40_v9  ;;  %v1056_v40 = vpop.f32.mrb[5].mxu1 }
 0x2b6   :  { %v576_v41 = vpop.f32.mrb[6].mxu1 }
 0x2b7   :  { %v579_v43 = vmax.f32 %v574_v39, 0.0  ;;  %v1057_v44 = vpop.f32.mrb[7].mxu1 }
 0x2b9   :  { %581 = vrot.lane.b32.xlu0 %v579_v43, %s1138_s7 }
 0x2bc   :  { %v716_v19 = vpop.f32.mrb[8].mxu1 }
 0x2bd   :  { %v1072_v20 = vpop.f32.mrb[9].mxu1 }
 0x2be   :  { %v719_v21 = vpop.f32.mrb[10].mxu1 }
 0x2bf   :  { %v1073_v22 = vpop.f32.mrb[11].mxu1 }
 0x32b   :  { %v582_v46 = vpop.permute.xlu0 %581 }
 0x32c   :  { %v584_v47 = vsel %vm104_vm3, 0.0, %v582_v46 }
 0x32d   :  { %v585_v48 = vsel %vm106_vm4, %v584_v47, 0.0  ;;  %vm521_vm4 = vcmask 64512  }
 0x32e   :  { %590 = vrot.lane.b32.xlu0 %v585_v48, %s1141_s9  ;;  %587 = vrot.lane.b32.xlu1 %v585_v48, %s1140_s8 }
 0x332   :  { %596 = vrot.lane.b32.xlu0 %v585_v48, %s1142_s10  ;;  %593 = vrot.lane.b32.xlu1 %v585_v48, %s1139_s1 }
 0x336   :  { %126 = vperm.xlu1 %1096, %v985_v49  }
 0x33a   :  { %1097 = vset.pattern.permute.xlu1 %v1145_v23 }
 0x3a0   :  { %v591_v50 = vpop.permute.xlu0 %590  ;;  %v588_v51 = vpop.permute.xlu1 %587 }
 0x3a1   :  { %v1003_v52 = vpack.c.bf16 %v588_v51, %v584_v47 }
 0x3a3   :  { %1059 = vmatpush3.bf16.msk.msra.mxu0 %vm1229_vm6, %v1003_v52 }
 0x3a4   :  { %v597_v53 = vpop.permute.xlu0 %596  ;;  %v594_v54 = vpop.permute.xlu1 %593  ;;  %1060 = vmatprep.subr.bf16.mxu0 %v1135_v2 }
 0x3a5   :  { %v600_v55 = vpack.c.bf16 %v594_v54, %v591_v50  ;;  %v601_v56 = vpack.c.bf16 %v597_v53, %v597_v53 }
 0x3a7   :  { %1061 = vmatpush3.bf16.msra.mxu0 %v600_v55  ;;  %v603_v57 = vsel %vm133_vm7, %v601_v56, 0 }
 0x3a8   :  { %1062 = vmatprep.subr.bf16.mxu0 %v1135_v2 }
 0x3ab   :  { %1063 = vmatpush3.bf16.msra.mxu0 %v603_v57 }
 0x3ae   :  { %1065 = vmatmul.mubr.msk.bf16.vlgmr.msra.gmra.mrb[8].mxu0 %vm129_vm8, %v26_v30 }
 0x3b5   :  { %v127_v58 = vpop.permute.xlu1 %126 }
 0x3b6   :  { %v1288_v59 = vadd.f32 %v171_v34, %v127_v58 }
 0x3b8   :  { %v178_v60 = vsel %vm177_vm10, %v1288_v59, 0.0 }
 0x3b9   :  { %179 = vadd.xlane.f32.xlu0 %v178_v60 }
 0x446   :  { %v180_v2 = vpop.xlane.xlu0 %179 }
 0x447   :  { %v182_v3 = vmul.f32 0.0625, %v180_v2  ;;  %v299_v2 = vunpack.c.l.s4 %v1151_v1 }
 0x449   :  { %v184_v4 = vrot.slane %v182_v3, 7  ;;  %v188_v5 = vrot.slane %v182_v3, 1  ;;  %v192_v32 = vmul.f32 %v182_v3, %v33_v8  ;;  %v301_v3 = vlaneseq }
 0x44b   :  { %v191_v6 = vsel %vm190_vm11, %v188_v5, 0.0  ;;  %v187_v7 = vsel %vm186_vm12, 0.0, %v184_v4  ;;  %v300_v5 = vunpack.c.0.s8 %v299_v2 }
 0x44c   :  { %200 = vrot.lane.b32.xlu0 %v191_v6, %s1138_s7  ;;  %v193_v9 = vmul.f32 %v187_v7, %v33_v8  ;;  %v1341_v6 = vshrl.u32 %v301_v3, 7 }
 0x450   :  { %195 = vrot.lane.b32.xlu0 %v193_v9, %s1144_s22  ;;  %v1344_v9 = vsub.s32 %v300_v5, %v1341_v6 }
 0x481   :  { %v639_v10 = vpop.f32.mrb[8].mxu0 }
 0x482   :  { %v1303_v11 = vadd.f32 %v639_v10, %v127_v58  ;;  %v1066_v12 = vpop.f32.mrb[9].mxu0 }
 0x483   :  { %v642_v13 = vpop.f32.mrb[10].mxu0  ;;  %v1152_v12 = vmov 1934713408  }
 0x484   :  { %v1067_v14 = vpop.f32.mrb[11].mxu0  ;;  %v645_v15 = vsel %vm177_vm10, %v1303_v11, 0.0  ;;  %v363_v13 = vunpack.c.l.s4 %v1152_v12 }
 0x485   :  { %646 = vadd.xlane.f32.xlu1 %v645_v15 }
 0x4be   :  { %v201_v16 = vpop.permute.xlu0 %200 }
 0x4bf   :  { %v203_v17 = vmul.f32 %v201_v16, %v33_v8 }
 0x4c1   :  { %205 = vrot.lane.b32.xlu0 %v203_v17, %s1140_s8 }
 0x4c2   :  { %v196_v31 = vpop.permute.xlu0 %195 }
 0x4c3   :  { %v198_v34 = vadd.f32 %v196_v31, %v192_v32 }
 0x4c5   :  { %217 = vperm.xlu0 %1095, %v986_v18   ;;  %v364_v18 = vunpack.c.0.s8 %v363_v13 }
 0x4c7   :  { %v1352_v22 = vsub.s32 %v364_v18, %v1341_v6 }
 0x4c9   :  { %1098 = vset.pattern.permute.xlu0 %v1145_v23 }
 0x512   :  { %v647_v24 = vpop.xlane.xlu1 %646 }
 0x513   :  { %v648_v25 = vmul.f32 0.0625, %v647_v24 }
 0x515   :  { %v650_v26 = vrot.slane %v648_v25, 7  ;;  %v653_v27 = vrot.slane %v648_v25, 1  ;;  %v656_v43 = vmul.f32 %v648_v25, %v33_v8 }
 0x517   :  { %v655_v28 = vsel %vm190_vm11, %v653_v27, 0.0  ;;  %v652_v29 = vsel %vm186_vm12, 0.0, %v650_v26 }
 0x518   :  { %664 = vrot.lane.b32.xlu1 %v655_v28, %s1138_s7  ;;  %v657_v30 = vmul.f32 %v652_v29, %v33_v8 }
 0x51c   :  { %659 = vrot.lane.b32.xlu1 %v657_v30, %s1144_s22 }
 0x533   :  { %v206_v33 = vpop.permute.xlu0 %205 }
 0x534   :  { %v208_v35 = vadd.f32 %v206_v33, %v198_v34 }
 0x536   :  { %v994_v36 = vmul.f32 -1.442695, %v208_v35 }
 0x538   :  { %1103 = vpow2.f32 %v994_v36 }
 0x542   :  { %v1104_v37 = vpop.eup %1103 }
 0x543   :  { %v212_v38 = vadd.f32 1.0, %v1104_v37 }
 0x544   :  { %v218_v49 = vpop.permute.xlu0 %217 }
 0x545   :  { %1105 = vrcp.f32 %v212_v38  ;;  %v262_v52 = vadd.f32 %v1295_v62, %v218_v49  ;;  %v717_v57 = vadd.f32 %v716_v19, %v218_v49 }
 0x54f   :  { %v1106_v41 = vpop.eup %1105 }
 0x58a   :  { %v665_v39 = vpop.permute.xlu1 %664 }
 0x58b   :  { %v667_v40 = vmul.f32 %v665_v39, %v33_v8 }
 0x58d   :  { %669 = vrot.lane.b32.xlu1 %v667_v40, %s1140_s8 }
 0x58e   :  { %v660_v42 = vpop.permute.xlu1 %659 }
 0x58f   :  { %v662_v44 = vadd.f32 %v660_v42, %v656_v43 }
 0x591   :  { %269 = vperm.xlu1 %1097, %v1106_v41  }
 0x5ff   :  { %v670_v45 = vpop.permute.xlu1 %669 }
 0x600   :  { %v672_v46 = vadd.f32 %v670_v45, %v662_v44 }
 0x602   :  { %v1006_v47 = vmul.f32 -1.442695, %v672_v46 }
 0x604   :  { %1107 = vpow2.f32 %v1006_v47 }
 0x60e   :  { %v1108_v48 = vpop.eup %1107 }
 0x60f   :  { %v676_v50 = vadd.f32 1.0, %v1108_v48 }
 0x610   :  { %v270_v51 = vpop.permute.xlu1 %269 }
 0x611   :  { %1109 = vrcp.f32 %v676_v50  ;;  %v272_v53 = vmul.f32 %v270_v51, %v1288_v59 }
 0x613   :  { %v1317_v54 = vadd.f32 %v272_v53, %v262_v52 }
 0x615   :  { %275 = vrot.lane.b32.xlu1 %v1317_v54, %s1141_s9 }
 0x619   :  { %278 = vrot.lane.b32.xlu1 %v1317_v54, %s1142_s10 }
 0x61b   :  { %v1110_v55 = vpop.eup %1109 }
 0x61c   :  { %724 = vperm.xlu0 %1098, %v1110_v55  }
 0x61d   :  { %284 = vrot.lane.b32.xlu1 %v1317_v54, %s1146_s4 }
 0x620   :  { %281 = vrot.lane.b32.xlu0 %v1317_v54, %s1147_s5 }
 0x621   :  { %290 = vrot.lane.b32.xlu1 %v1317_v54, %s1148_s25 }
 0x624   :  { %287 = vrot.lane.b32.xlu0 %v1317_v54, %s1149_s26 }
 0x628   :  { %293 = vrot.lane.b32.xlu0 %v1317_v54, %s1150_s27 }
 0x687   :  { %v276_v60 = vpop.permute.xlu1 %275 }
 0x68b   :  { %v279_v62 = vpop.permute.xlu1 %278 }
 0x68c   :  { %v296_v14 = vcombine.low %v1317_v54, %v279_v62  ;;  %v297_v32 = vcombine.high %v1317_v54, %v279_v62 }
 0x68e   :  { %v304_v19 = vrot.slane %v296_v14, %v1344_v9  ;;  %v311_v39 = vrot.slane %v297_v32, %v1344_v9 }
 0x68f   :  { %v285_v0 = vpop.permute.xlu1 %284 }
 0x693   :  { %v291_v7 = vpop.permute.xlu1 %290 }
 0x694   :  { %v328_v10 = vcombine.low %v285_v0, %v291_v7  ;;  %v329_v29 = vcombine.high %v285_v0, %v291_v7 }
 0x696   :  { %v336_v16 = vrot.slane %v328_v10, %v1344_v9  ;;  %v343_v36 = vrot.slane %v329_v29, %v1344_v9 }
 0x69b   :  { %v725_v56 = vpop.permute.xlu0 %724 }
 0x69c   :  { %v727_v58 = vmul.f32 %v725_v56, %v1303_v11 }
 0x69e   :  { %v1329_v59 = vadd.f32 %v727_v58, %v717_v57 }
 0x69f   :  { %v282_v61 = vpop.permute.xlu0 %281 }
 0x6a0   :  { %733 = vrot.lane.b32.xlu0 %v1329_v59, %s1142_s10  ;;  %730 = vrot.lane.b32.xlu1 %v1329_v59, %s1141_s9  ;;  %v312_v11 = vcombine.low %v276_v60, %v282_v61  ;;  %v313_v30 = vcombine.high %v276_v60, %v282_v61 }
 0x6a2   :  { %v320_v17 = vrot.slane %v312_v11, %v1344_v9  ;;  %v327_v37 = vrot.slane %v313_v30, %v1344_v9 }
 0x6a3   :  { %v288_v63 = vpop.permute.xlu0 %287 }
 0x6a4   :  { %739 = vrot.lane.b32.xlu0 %v1329_v59, %s1146_s4  ;;  %736 = vrot.lane.b32.xlu1 %v1329_v59, %s1147_s5  ;;  %v360_v21 = vcombine.low %v304_v19, %v320_v17  ;;  %v361_v31 = vcombine.high %v304_v19, %v320_v17  ;;  %v376_v43 = vcombine.low %v311_v39, %v327_v37 }
 0x6a5   :  { %v377_v51 = vcombine.high %v311_v39, %v327_v37 }
 0x6a6   :  { %v368_v24 = vrot.slane %v360_v21, %v1352_v22  ;;  %v375_v38 = vrot.slane %v361_v31, %v1352_v22  ;;  %v384_v47 = vrot.slane %v376_v43, %v1352_v22 }
 0x6a7   :  { %v294_v4 = vpop.permute.xlu0 %293  ;;  %v391_v55 = vrot.slane %v377_v51, %v1352_v22 }
 0x6a8   :  { %745 = vrot.lane.b32.xlu0 %v1329_v59, %s1148_s25  ;;  %742 = vrot.lane.b32.xlu1 %v1329_v59, %s1149_s26  ;;  %v344_v8 = vcombine.low %v288_v63, %v294_v4  ;;  %v345_v27 = vcombine.high %v288_v63, %v294_v4 }
 0x6aa   :  { %v352_v15 = vrot.slane %v344_v8, %v1344_v9  ;;  %v359_v33 = vrot.slane %v345_v27, %v1344_v9 }
 0x6ac   :  { %748 = vrot.lane.b32.xlu1 %v1329_v59, %s1150_s27  ;;  %v392_v20 = vcombine.low %v336_v16, %v352_v15  ;;  %v393_v28 = vcombine.high %v336_v16, %v352_v15  ;;  %v408_v40 = vcombine.low %v343_v36, %v359_v33  ;;  %v409_v48 = vcombine.high %v343_v36, %v359_v33 }
 0x6ae   :  { %v400_v23 = vrot.slane %v392_v20, %v1352_v22  ;;  %v407_v35 = vrot.slane %v393_v28, %v1352_v22  ;;  %v416_v46 = vrot.slane %v408_v40, %v1352_v22  ;;  %v423_v54 = vrot.slane %v409_v48, %v1352_v22 }
 0x6b0   :  { %v424_v25 = vcombine.low %v368_v24, %v400_v23  ;;  %v425_v34 = vcombine.high %v368_v24, %v400_v23  ;;  %v426_v42 = vcombine.low %v375_v38, %v407_v35  ;;  %v427_v45 = vcombine.high %v375_v38, %v407_v35 }
 0x6b1   :  { %v428_v50 = vcombine.low %v384_v47, %v416_v46  ;;  %v429_v53 = vcombine.high %v384_v47, %v416_v46  ;;  %v430_v57 = vcombine.low %v391_v55, %v423_v54  ;;  %v431_v60 = vcombine.high %v391_v55, %v423_v54 }
 0x6b2   :  { %v432_v26 = vsel %vm104_vm3, %v424_v25, -inf  ;;  %v435_v41 = vsel %vm104_vm3, %v425_v34, -inf  ;;  %v438_v44 = vsel %vm104_vm3, %v426_v42, -inf  ;;  %v441_v49 = vsel %vm104_vm3, %v427_v45, -inf }
 0x6b3   :  { %v444_v52 = vsel %vm104_vm3, %v428_v50, -inf  ;;  %v447_v56 = vsel %vm104_vm3, %v429_v53, -inf  ;;  %v450_v58 = vsel %vm104_vm3, %v430_v57, -inf  ;;  %v453_v61 = vsel %vm104_vm3, %v431_v60, -inf }
 0x6b4   :  { %v473_v60 = vand.u32 127, %v301_v3 }
 0x6c7   :  { %433 = vmax.xlane.f32.xlu0 %v432_v26 }
 0x6d0   :  { %436 = vmax.xlane.f32.xlu1 %v435_v41 }
 0x6d4   :  { %439 = vmax.xlane.f32.xlu1 %v438_v44 }
 0x6d8   :  { %442 = vmax.xlane.f32.xlu1 %v441_v49 }
 0x6dc   :  { %445 = vmax.xlane.f32.xlu1 %v444_v52 }
 0x6e0   :  { %448 = vmax.xlane.f32.xlu1 %v447_v56 }
 0x6e4   :  { %451 = vmax.xlane.f32.xlu1 %v450_v58 }
 0x6e8   :  { %454 = vmax.xlane.f32.xlu1 %v453_v61 }
 0x712   :  { %v734_v62 = vpop.permute.xlu0 %733  ;;  %v731_v63 = vpop.permute.xlu1 %730 }
 0x713   :  { %v751_v7 = vcombine.low %v1329_v59, %v734_v62  ;;  %v752_v27 = vcombine.high %v1329_v59, %v734_v62 }
 0x715   :  { %v759_v12 = vrot.slane %v751_v7, %v1344_v9  ;;  %v766_v35 = vrot.slane %v752_v27, %v1344_v9 }
 0x716   :  { %v740_v0 = vpop.permute.xlu0 %739  ;;  %v737_v1 = vpop.permute.xlu1 %736 }
 0x717   :  { %v767_v2 = vcombine.low %v731_v63, %v737_v1  ;;  %v768_v23 = vcombine.high %v731_v63, %v737_v1 }
 0x719   :  { %v775_v8 = vrot.slane %v767_v2, %v1344_v9  ;;  %v782_v32 = vrot.slane %v768_v23, %v1344_v9 }
 0x71a   :  { %v746_v4 = vpop.permute.xlu0 %745  ;;  %v743_v5 = vpop.permute.xlu1 %742 }
 0x71b   :  { %v783_v10 = vcombine.low %v740_v0, %v746_v4  ;;  %v815_v14 = vcombine.low %v759_v12, %v775_v8  ;;  %v816_v24 = vcombine.high %v759_v12, %v775_v8  ;;  %v784_v25 = vcombine.high %v740_v0, %v746_v4 }
 0x71c   :  { %v831_v38 = vcombine.low %v766_v35, %v782_v32  ;;  %v1403_v0 = vsub.s32 %v473_v60, %v1341_v6 }
 0x71d   :  { %v791_v15 = vrot.slane %v783_v10, %v1344_v9  ;;  %v823_v20 = vrot.slane %v815_v14, %v1352_v22  ;;  %v798_v33 = vrot.slane %v784_v25, %v1344_v9  ;;  %v830_v34 = vrot.slane %v816_v24, %v1352_v22 }
 0x71e   :  { %v749_v11 = vpop.permute.xlu1 %748  ;;  %v839_v42 = vrot.slane %v831_v38, %v1352_v22 }
 0x71f   :  { %v799_v13 = vcombine.low %v743_v5, %v749_v11  ;;  %v800_v18 = vcombine.high %v743_v5, %v749_v11 }
 0x721   :  { %v807_v16 = vrot.slane %v799_v13, %v1344_v9  ;;  %v814_v28 = vrot.slane %v800_v18, %v1344_v9  ;;  %v832_v9 = vcombine.high %v766_v35, %v782_v32 }
 0x723   :  { %v847_v17 = vcombine.low %v791_v15, %v807_v16  ;;  %v848_v19 = vcombine.high %v791_v15, %v807_v16  ;;  %v863_v36 = vcombine.low %v798_v33, %v814_v28  ;;  %v864_v43 = vcombine.high %v798_v33, %v814_v28 }
 0x724   :  { %v846_v49 = vrot.slane %v832_v9, %v1352_v22 }
 0x725   :  { %v855_v21 = vrot.slane %v847_v17, %v1352_v22  ;;  %v862_v31 = vrot.slane %v848_v19, %v1352_v22  ;;  %v871_v41 = vrot.slane %v863_v36, %v1352_v22  ;;  %v878_v48 = vrot.slane %v864_v43, %v1352_v22 }
 0x727   :  { %v879_v26 = vcombine.low %v823_v20, %v855_v21  ;;  %v880_v30 = vcombine.high %v823_v20, %v855_v21  ;;  %v881_v59 = vcombine.low %v830_v34, %v862_v31  ;;  %v882_v40 = vcombine.high %v830_v34, %v862_v31 }
 0x728   :  { %v883_v45 = vcombine.low %v839_v42, %v871_v41  ;;  %v884_v47 = vcombine.high %v839_v42, %v871_v41  ;;  %v885_v51 = vcombine.low %v846_v49, %v878_v48  ;;  %v886_v53 = vcombine.high %v846_v49, %v878_v48 }
 0x729   :  { %v887_v29 = vsel %vm104_vm3, %v879_v26, -inf  ;;  %v890_v37 = vsel %vm104_vm3, %v880_v30, -inf  ;;  %v893_v39 = vsel %vm104_vm3, %v881_v59, -inf  ;;  %v896_v44 = vsel %vm104_vm3, %v882_v40, -inf }
 0x72a   :  { %888 = vmax.xlane.f32.xlu0 %v887_v29  ;;  %v899_v46 = vsel %vm104_vm3, %v883_v45, -inf  ;;  %v902_v50 = vsel %vm104_vm3, %v884_v47, -inf  ;;  %v905_v52 = vsel %vm104_vm3, %v885_v51, -inf  ;;  %v908_v54 = vsel %vm104_vm3, %v886_v53, -inf }
 0x72b   :  { %vm518_vm3 = vcmask 1047559  }
 0x72e   :  { %891 = vmax.xlane.f32.xlu0 %v890_v37 }
 0x732   :  { %894 = vmax.xlane.f32.xlu0 %v893_v39 }
 0x736   :  { %897 = vmax.xlane.f32.xlu0 %v896_v44 }
 0x73a   :  { %900 = vmax.xlane.f32.xlu0 %v899_v46 }
 0x73e   :  { %903 = vmax.xlane.f32.xlu0 %v902_v50 }
 0x742   :  { %906 = vmax.xlane.f32.xlu0 %v905_v52 }
 0x746   :  { %909 = vmax.xlane.f32.xlu0 %v908_v54 }
 0x754   :  { %v434_v61 = vpop.xlane.xlu0 %433 }
 0x755   :  { %v456_v1 = vmax.f32 %v434_v61, 0.0 }
 0x757   :  { %v477_v11 = vrot.slane %v456_v1, %v1403_v0 }
 0x75d   :  { %v437_v55 = vpop.xlane.xlu1 %436 }
 0x75e   :  { %v457_v62 = vmax.f32 %v437_v55, 0.0 }
 0x760   :  { %v481_v5 = vrot.slane %v457_v62, %v1403_v0 }
 0x761   :  { %v440_v56 = vpop.xlane.xlu1 %439 }
 0x762   :  { %v458_v22 = vmax.f32 %v440_v56, 0.0  ;;  %v507_v13 = vsel %vm506_vm13, %v481_v5, %v477_v11 }
 0x764   :  { %v485_v8 = vrot.slane %v458_v22, %v1403_v0 }
 0x765   :  { %v443_v57 = vpop.xlane.xlu1 %442 }
 0x766   :  { %v459_v2 = vmax.f32 %v443_v57, 0.0  ;;  %v509_v15 = vsel %vm508_vm14, %v485_v8, %v507_v13 }
 0x768   :  { %v489_v3 = vrot.slane %v459_v2, %v1403_v0 }
 0x769   :  { %v446_v58 = vpop.xlane.xlu1 %445 }
 0x76a   :  { %v460_v4 = vmax.f32 %v446_v58, 0.0  ;;  %v511_v18 = vsel %vm510_vm15, %v489_v3, %v509_v15 }
 0x76c   :  { %v493_v6 = vrot.slane %v460_v4, %v1403_v0 }
 0x76d   :  { %v449_v63 = vpop.xlane.xlu1 %448 }
 0x76e   :  { %v461_v7 = vmax.f32 %v449_v63, 0.0  ;;  %v513_v20 = vsel %vm512_vm0, %v493_v6, %v511_v18 }
 0x770   :  { %v497_v14 = vrot.slane %v461_v7, %v1403_v0 }
 0x771   :  { %v452_v10 = vpop.xlane.xlu1 %451 }
 0x772   :  { %v462_v12 = vmax.f32 %v452_v10, 0.0  ;;  %v515_v21 = vsel %vm514_vm1, %v497_v14, %v513_v20 }
 0x774   :  { %v501_v16 = vrot.slane %v462_v12, %v1403_v0 }
 0x775   :  { %v455_v17 = vpop.xlane.xlu1 %454 }
 0x776   :  { %v463_v19 = vmax.f32 %v455_v17, 0.0  ;;  %v517_v24 = vsel %vm516_vm2, %v501_v16, %v515_v21 }
 0x778   :  { %v505_v23 = vrot.slane %v463_v19, %v1403_v0 }
 0x77a   :  { %v519_v25 = vsel %vm518_vm3, %v505_v23, %v517_v24 }
 0x77b   :  { %522 = vst.msk [vmem:[#allocation2] sm:$0xff] %vm521_vm4, %v519_v25 }
 0x7b7   :  { %v889_v26 = vpop.xlane.xlu0 %888 }
 0x7b8   :  { %v911_v34 = vmax.f32 %v889_v26, 0.0 }
 0x7ba   :  { %v930_v40 = vrot.slane %v911_v34, %v1403_v0 }
 0x7bb   :  { %v892_v27 = vpop.xlane.xlu0 %891 }
 0x7bc   :  { %v912_v31 = vmax.f32 %v892_v27, 0.0 }
 0x7be   :  { %v934_v37 = vrot.slane %v912_v31, %v1403_v0 }
 0x7bf   :  { %v895_v28 = vpop.xlane.xlu0 %894 }
 0x7c0   :  { %v913_v32 = vmax.f32 %v895_v28, 0.0  ;;  %v959_v44 = vsel %vm506_vm13, %v934_v37, %v930_v40 }
 0x7c2   :  { %v938_v38 = vrot.slane %v913_v32, %v1403_v0 }
 0x7c3   :  { %v898_v29 = vpop.xlane.xlu0 %897 }
 0x7c4   :  { %v914_v35 = vmax.f32 %v898_v29, 0.0  ;;  %v960_v9 = vsel %vm508_vm14, %v938_v38, %v959_v44 }
 0x7c6   :  { %v942_v41 = vrot.slane %v914_v35, %v1403_v0 }
 0x7c7   :  { %v901_v30 = vpop.xlane.xlu0 %900 }
 0x7c8   :  { %v915_v36 = vmax.f32 %v901_v30, 0.0  ;;  %v961_v48 = vsel %vm510_vm15, %v942_v41, %v960_v9 }
 0x7ca   :  { %v946_v43 = vrot.slane %v915_v36, %v1403_v0 }
 0x7cb   :  { %v904_v33 = vpop.xlane.xlu0 %903 }
 0x7cc   :  { %v916_v59 = vmax.f32 %v904_v33, 0.0  ;;  %v962_v50 = vsel %vm512_vm0, %v946_v43, %v961_v48 }
 0x7ce   :  { %v950_v45 = vrot.slane %v916_v59, %v1403_v0 }
 0x7cf   :  { %v907_v39 = vpop.xlane.xlu0 %906 }
 0x7d0   :  { %v917_v42 = vmax.f32 %v907_v39, 0.0  ;;  %v963_v51 = vsel %vm514_vm1, %v950_v45, %v962_v50 }
 0x7d2   :  { %v954_v46 = vrot.slane %v917_v42, %v1403_v0 }
 0x7d3   :  { %v910_v47 = vpop.xlane.xlu0 %909 }
 0x7d4   :  { %v918_v49 = vmax.f32 %v910_v47, 0.0  ;;  %v964_v53 = vsel %vm516_vm2, %v954_v46, %v963_v51 }
 0x7d6   :  { %v958_v52 = vrot.slane %v918_v49, %v1403_v0 }
 0x7d8   :  { %v965_v54 = vsel %vm518_vm3, %v958_v52, %v964_v53 }
 0x7d9   :  { %968 = vst.msk [vmem:[#allocation2 + $0x8] sm:$0xff] %vm521_vm4, %v965_v54 }
 0x7da   :  { %1122 = shalt.err (!%p1119_p4)
}
 0x7db   :  { %s1123_s8 = scalar_lea.hbm %s1455_s6, 256 }
 0x7dc   :  { %p1124_p5 = scmp.ne.s32.totalorder %s1455_s6, %s1123_s8  ;;  %p1127_p6 = scmp.lt.u32.totalorder %s1123_s8, %s1455_s6 }
 0x7de   :  { %p1129_p7 = pnand %p1127_p6, %p1124_p5 }
 0x7e0   :  { %1132 = shalt.err (!%p1129_p7)
}
 0x7e1   :  { %s1154_s13 = smov 128   ;;  %s1155_s14 = smov 8  }
 0x7e2   :  { %980 = dma.vmem_to_hbm [thread:$0]  %s975_s29, 256, %s1455_s6, [#allocation3], %s1154_s13, %s1154_s13, %s1155_s14  }
 0x7e3   :  { %1133 = dma.done.wait [#allocation3], 256  }
 0x7e4   :  { %1134 = vsyncadd [#allocation3], 4294967040 }
 0x7e5   :  { %984 = vsyncpa [#allocation3], 1 }

</bundles_post_ra>
